<compile_context>
chip_gen: v5e
topology: v5e:2x2
jax: 0.10.0
libtpu: 0.0.40
codegen_flags: <defaults>
</compile_context>

<pallas_src>
import functools

import jax
import jax.numpy as jnp
from jax.experimental import pallas as pl
from jax.experimental.pallas import tpu as pltpu


def _round_up(n, m):
    return ((n + m - 1) // m) * m


def _dbn_kernel(n_layers, output_units, *refs):
    # refs = (x_ref, W0, b0, W1, b1, ..., head_w, head_b, out_ref)
    x_ref = refs[0]
    out_ref = refs[-1]
    layer_refs = refs[1:-1]

    h_lo = x_ref[...]                         # bf16 (TB, visible) MXU operand
    h_f32 = h_lo.astype(jnp.float32)          # only used if n_layers == 0

    # RBM stack: sigmoid(h @ W + b) per layer. bf16 MXU inputs, f32 accumulate,
    # bias add + sigmoid on VPU/EUP in f32.
    for i in range(n_layers):
        w = layer_refs[2 * i][...]            # bf16 (in_i, hid_i), resident
        b = layer_refs[2 * i + 1][...]        # f32  (1, hid_i),   resident
        z = jnp.dot(h_lo, w, preferred_element_type=jnp.float32) + b
        h_f32 = jax.nn.sigmoid(z)
        h_lo = h_f32.astype(jnp.bfloat16)

    head_w = layer_refs[2 * n_layers][...]
    head_b = layer_refs[2 * n_layers + 1][...]   # f32 (1, output_units)

    if output_units == 1:
        # 1-wide head: VPU multiply + lane reduce instead of a wasted MXU pass.
        out = jnp.sum(h_f32 * head_w, axis=-1, keepdims=True) + head_b
    else:
        # General head: bf16 matmul with f32 accumulation.
        out = jnp.dot(h_lo, head_w, preferred_element_type=jnp.float32) + head_b

    out_ref[...] = out.astype(out_ref.dtype)


def dbn_forward(x, rbm_weights, rbm_biases, bpnn_w, bpnn_b, *, block_batch=512):
    """DBN forward pass in a single Pallas kernel, tiled over the batch axis.

    Args:
      x:            [batch, visible_units] float32
      rbm_weights:  list of [in_i, hidden_i] float32
      rbm_biases:   list of [hidden_i] float32
      bpnn_w:       [output_units, hidden_last] float32 (torch Linear layout)
      bpnn_b:       [output_units] float32
    Returns:
      [batch, output_units] float32
    """
    n_layers = len(rbm_weights)
    batch, visible = x.shape
    output_units = bpnn_w.shape[0]

    # Batch tile: >=256-512 rows amortizes grid overhead; small batches just
    # round up to a sublane multiple. Pad so the grid divides exactly.
    tb = min(block_batch, _round_up(max(batch, 1), 8))
    padded = _round_up(batch, tb)
    if padded != batch:
        x = jnp.pad(x, ((0, padded - batch), (0, 0)))
    grid = (pl.cdiv(padded, tb),)

    # Operand prep (glue): bf16 matmul operands, f32 biases reshaped to rows,
    # head weight either as a (1, H) f32 row (reduce path) or transposed bf16.
    operands = [x.astype(jnp.bfloat16)]
    in_specs = [pl.BlockSpec((tb, visible), lambda i: (i, 0))]

    for w, b in zip(rbm_weights, rbm_biases):
        w_bf = w.astype(jnp.bfloat16)
        b_row = b.reshape(1, -1).astype(jnp.float32)
        operands += [w_bf, b_row]
        in_specs += [
            pl.BlockSpec(w_bf.shape, lambda i: (0, 0)),     # resident weight
            pl.BlockSpec(b_row.shape, lambda i: (0, 0)),    # resident bias
        ]

    if output_units == 1:
        head_w = bpnn_w.reshape(1, -1).astype(jnp.float32)  # (1, hidden_last)
    else:
        head_w = bpnn_w.T.astype(jnp.bfloat16)               # (hidden_last, O)
    head_b = bpnn_b.reshape(1, -1).astype(jnp.float32)       # (1, O)
    operands += [head_w, head_b]
    in_specs += [
        pl.BlockSpec(head_w.shape, lambda i: (0, 0)),
        pl.BlockSpec(head_b.shape, lambda i: (0, 0)),
    ]

    out = pl.pallas_call(
        functools.partial(_dbn_kernel, n_layers, output_units),
        out_shape=jax.ShapeDtypeStruct((padded, output_units), jnp.float32),
        grid=grid,
        in_specs=in_specs,
        out_specs=pl.BlockSpec((tb, output_units), lambda i: (i, 0)),
        compiler_params=pltpu.CompilerParams(
            dimension_semantics=("parallel",)),
    )(*operands)

    # Drop padded rows.
    return out[:batch]


def dbn_forward_ref_f32(x, rbm_weights, rbm_biases, bpnn_w, bpnn_b):
    """Pure-f32 reference (matches the original PyTorch semantics)."""
    h = x
    for w, b in zip(rbm_weights, rbm_biases):
        h = jax.nn.sigmoid(h @ w + b)
    return h @ bpnn_w.T + bpnn_b


def dbn_forward_ref_bf16(x, rbm_weights, rbm_biases, bpnn_w, bpnn_b):
    """Reference with the same bf16-operand / f32-accumulate strategy as the kernel."""
    h_lo = x.astype(jnp.bfloat16)
    h = x.astype(jnp.float32)
    for w, b in zip(rbm_weights, rbm_biases):
        z = jnp.dot(h_lo, w.astype(jnp.bfloat16),
                    preferred_element_type=jnp.float32) + b
        h = jax.nn.sigmoid(z)
        h_lo = h.astype(jnp.bfloat16)
    if bpnn_w.shape[0] == 1:
        return (jnp.sum(h * bpnn_w.reshape(1, -1), axis=-1, keepdims=True)
                + bpnn_b.reshape(1, -1))
    return jnp.dot(h_lo, bpnn_w.T.astype(jnp.bfloat16),
                   preferred_element_type=jnp.float32) + bpnn_b


def _make_params(key, visible_units, hidden_units, output_units):
    keys = jax.random.split(key, 2 * len(hidden_units) + 2)
    rbm_weights, rbm_biases = [], []
    in_size = visible_units
    ki = 0
    for h in hidden_units:
        rbm_weights.append(
            0.05 * jax.random.normal(keys[ki], (in_size, h), dtype=jnp.float32))
        ki += 1
        rbm_biases.append(
            0.05 * jax.random.normal(keys[ki], (h,), dtype=jnp.float32))
        ki += 1
        in_size = h
    bpnn_w = 0.05 * jax.random.normal(
        keys[ki], (output_units, hidden_units[-1]), dtype=jnp.float32)
    ki += 1
    bpnn_b = 0.05 * jax.random.normal(
        keys[ki], (output_units,), dtype=jnp.float32)
    return rbm_weights, rbm_biases, bpnn_w, bpnn_b


if __name__ == "__main__":
    # Model config mirroring DBN(hidden_units=[32, 64], visible_units=31,
    # output_units=1, activate='Sigmoid')
    visible_units = 31
    hidden_units = [32, 64]
    output_units = 1

    key = jax.random.PRNGKey(0)
    pkey, x1_key, x2_key = jax.random.split(key, 3)
    rbm_weights, rbm_biases, bpnn_w, bpnn_b = _make_params(
        pkey, visible_units, hidden_units, output_units)

    # Test 1: small batch (single grid step, tb rounded up to sublane multiple).
    x_small = jax.random.normal(x1_key, (8, visible_units), dtype=jnp.float32)
    out_small = jax.block_until_ready(
        dbn_forward(x_small, rbm_weights, rbm_biases, bpnn_w, bpnn_b))
    assert out_small.shape == (8, output_units), out_small.shape
    ref_bf16 = dbn_forward_ref_bf16(x_small, rbm_weights, rbm_biases, bpnn_w, bpnn_b)
    ref_f32 = dbn_forward_ref_f32(x_small, rbm_weights, rbm_biases, bpnn_w, bpnn_b)
    assert jnp.allclose(out_small, ref_bf16, atol=1e-4, rtol=1e-4), (out_small, ref_bf16)
    assert jnp.allclose(out_small, ref_f32, atol=2e-2, rtol=0.0), (out_small, ref_f32)

    # Test 2: non-multiple batch to exercise the batch grid + tail padding.
    x_big = jax.random.normal(x2_key, (600, visible_units), dtype=jnp.float32)
    out_big = jax.block_until_ready(
        dbn_forward(x_big, rbm_weights, rbm_biases, bpnn_w, bpnn_b))
    assert out_big.shape == (600, output_units), out_big.shape
    ref_big_bf16 = dbn_forward_ref_bf16(x_big, rbm_weights, rbm_biases, bpnn_w, bpnn_b)
    ref_big_f32 = dbn_forward_ref_f32(x_big, rbm_weights, rbm_biases, bpnn_w, bpnn_b)
    assert jnp.allclose(out_big, ref_big_bf16, atol=1e-4, rtol=1e-4)
    assert jnp.allclose(out_big, ref_big_f32, atol=2e-2, rtol=0.0)

    print("KERNEL_OK")
</pallas_src>

<mosaic_0001>
module attributes {stable_mosaic.version = 11 : i64} {
  func.func @_dbn_kernel(%arg0: i32, %arg1: memref<8x31xbf16, #tpu.memory_space<vmem>>, %arg2: memref<31x32xbf16, #tpu.memory_space<vmem>>, %arg3: memref<1x32xf32, #tpu.memory_space<vmem>>, %arg4: memref<32x64xbf16, #tpu.memory_space<vmem>>, %arg5: memref<1x64xf32, #tpu.memory_space<vmem>>, %arg6: memref<1x64xf32, #tpu.memory_space<vmem>>, %arg7: memref<1x1xf32, #tpu.memory_space<vmem>>, %arg8: memref<8x1xf32, #tpu.memory_space<vmem>>) attributes {dimension_semantics = [#tpu.dimension_semantics<parallel>], iteration_bounds = array<i64: 1>, scalar_prefetch = 0 : i64, scratch_operands = 0 : i64, tpu.core_type = #tpu.core_type<tc>, window_params = [{transform_indices = @transform_0, window_bounds = array<i64: 8, 31>}, {pipeline_mode = #tpu.pipeline_mode<synchronous>, transform_indices = @transform_1, window_bounds = array<i64: 31, 32>}, {pipeline_mode = #tpu.pipeline_mode<synchronous>, transform_indices = @transform_2, window_bounds = array<i64: 1, 32>}, {pipeline_mode = #tpu.pipeline_mode<synchronous>, transform_indices = @transform_3, window_bounds = array<i64: 32, 64>}, {pipeline_mode = #tpu.pipeline_mode<synchronous>, transform_indices = @transform_4, window_bounds = array<i64: 1, 64>}, {pipeline_mode = #tpu.pipeline_mode<synchronous>, transform_indices = @transform_5, window_bounds = array<i64: 1, 64>}, {pipeline_mode = #tpu.pipeline_mode<synchronous>, transform_indices = @transform_6, window_bounds = array<i64: 1, 1>}, {transform_indices = @transform_7, window_bounds = array<i64: 8, 1>}]} {
    %c0 = arith.constant 0 : index
    %c0_0 = arith.constant 0 : index
    %0 = vector.load %arg1[%c0, %c0_0] : memref<8x31xbf16, #tpu.memory_space<vmem>>, vector<8x31xbf16>
    %c0_1 = arith.constant 0 : index
    %c0_2 = arith.constant 0 : index
    %1 = vector.load %arg2[%c0_1, %c0_2] : memref<31x32xbf16, #tpu.memory_space<vmem>>, vector<31x32xbf16>
    %c0_3 = arith.constant 0 : index
    %c0_4 = arith.constant 0 : index
    %2 = vector.load %arg3[%c0_3, %c0_4] : memref<1x32xf32, #tpu.memory_space<vmem>>, vector<1x32xf32>
    %cst = arith.constant dense<0.000000e+00> : vector<8x32xf32>
    %3 = tpu.matmul %0, %1, %cst {dimension_numbers = #tpu.dot_dimension_numbers<[1], [0], [0], [1], [0, 0, 1, 1], [], []>} : vector<8x31xbf16>, vector<31x32xbf16>, vector<8x32xf32> -> vector<8x32xf32>
    %4 = vector.broadcast %2 : vector<1x32xf32> to vector<8x32xf32>
    %5 = arith.addf %3, %4 : vector<8x32xf32>
    %6 = arith.negf %5 : vector<8x32xf32>
    %7 = math.exp %6 : vector<8x32xf32>
    %cst_5 = arith.constant 1.000000e+00 : f32
    %8 = vector.broadcast %cst_5 : f32 to vector<8x32xf32>
    %9 = arith.addf %8, %7 : vector<8x32xf32>
    %10 = arith.divf %8, %9 : vector<8x32xf32>
    %11 = arith.truncf %10 : vector<8x32xf32> to vector<8x32xbf16>
    %c0_6 = arith.constant 0 : index
    %c0_7 = arith.constant 0 : index
    %12 = vector.load %arg4[%c0_6, %c0_7] : memref<32x64xbf16, #tpu.memory_space<vmem>>, vector<32x64xbf16>
    %c0_8 = arith.constant 0 : index
    %c0_9 = arith.constant 0 : index
    %13 = vector.load %arg5[%c0_8, %c0_9] : memref<1x64xf32, #tpu.memory_space<vmem>>, vector<1x64xf32>
    %cst_10 = arith.constant dense<0.000000e+00> : vector<8x64xf32>
    %14 = tpu.matmul %11, %12, %cst_10 {dimension_numbers = #tpu.dot_dimension_numbers<[1], [0], [0], [1], [0, 0, 1, 1], [], []>} : vector<8x32xbf16>, vector<32x64xbf16>, vector<8x64xf32> -> vector<8x64xf32>
    %15 = vector.broadcast %13 : vector<1x64xf32> to vector<8x64xf32>
    %16 = arith.addf %14, %15 : vector<8x64xf32>
    %17 = arith.negf %16 : vector<8x64xf32>
    %18 = math.exp %17 : vector<8x64xf32>
    %cst_11 = arith.constant 1.000000e+00 : f32
    %19 = vector.broadcast %cst_11 : f32 to vector<8x64xf32>
    %20 = arith.addf %19, %18 : vector<8x64xf32>
    %21 = arith.divf %19, %20 : vector<8x64xf32>
    %c0_12 = arith.constant 0 : index
    %c0_13 = arith.constant 0 : index
    %22 = vector.load %arg6[%c0_12, %c0_13] : memref<1x64xf32, #tpu.memory_space<vmem>>, vector<1x64xf32>
    %c0_14 = arith.constant 0 : index
    %c0_15 = arith.constant 0 : index
    %23 = vector.load %arg7[%c0_14, %c0_15] : memref<1x1xf32, #tpu.memory_space<vmem>>, vector<1x1xf32>
    %24 = vector.broadcast %22 : vector<1x64xf32> to vector<8x64xf32>
    %25 = arith.mulf %21, %24 : vector<8x64xf32>
    %cst_16 = arith.constant dense<0.000000e+00> : vector<8xf32>
    %26 = vector.multi_reduction <add>, %25, %cst_16 [1] : vector<8x64xf32> to vector<8xf32>
    %27 = vector.shape_cast %26 : vector<8xf32> to vector<8x1xf32>
    %28 = vector.broadcast %23 : vector<1x1xf32> to vector<8x1xf32>
    %29 = arith.addf %27, %28 : vector<8x1xf32>
    %c0_17 = arith.constant 0 : index
    %c0_18 = arith.constant 0 : index
    %30 = vector.load %arg8[%c0_17, %c0_18] : memref<8x1xf32, #tpu.memory_space<vmem>>, vector<8x1xf32>
    tpu.vector_store %arg8[%c0_17, %c0_18], %29 {strides = array<i32>} : memref<8x1xf32, #tpu.memory_space<vmem>>, vector<8x1xf32>,
    return
  }
  func.func @transform_0(%arg0: i32) -> (i32, i32) {
    %c0_i32 = arith.constant 0 : i32
    %c0_i32_0 = arith.constant 0 : i32
    return %arg0, %c0_i32 : i32, i32
  }
  func.func @transform_1(%arg0: i32) -> (i32, i32) {
    %c0_i32 = arith.constant 0 : i32
    %c0_i32_0 = arith.constant 0 : i32
    %c0_i32_1 = arith.constant 0 : i32
    return %c0_i32, %c0_i32_0 : i32, i32
  }
  func.func @transform_2(%arg0: i32) -> (i32, i32) {
    %c0_i32 = arith.constant 0 : i32
    %c0_i32_0 = arith.constant 0 : i32
    %c0_i32_1 = arith.constant 0 : i32
    return %c0_i32, %c0_i32_0 : i32, i32
  }
  func.func @transform_3(%arg0: i32) -> (i32, i32) {
    %c0_i32 = arith.constant 0 : i32
    %c0_i32_0 = arith.constant 0 : i32
    %c0_i32_1 = arith.constant 0 : i32
    return %c0_i32, %c0_i32_0 : i32, i32
  }
  func.func @transform_4(%arg0: i32) -> (i32, i32) {
    %c0_i32 = arith.constant 0 : i32
    %c0_i32_0 = arith.constant 0 : i32
    %c0_i32_1 = arith.constant 0 : i32
    return %c0_i32, %c0_i32_0 : i32, i32
  }
  func.func @transform_5(%arg0: i32) -> (i32, i32) {
    %c0_i32 = arith.constant 0 : i32
    %c0_i32_0 = arith.constant 0 : i32
    %c0_i32_1 = arith.constant 0 : i32
    return %c0_i32, %c0_i32_0 : i32, i32
  }
  func.func @transform_6(%arg0: i32) -> (i32, i32) {
    %c0_i32 = arith.constant 0 : i32
    %c0_i32_0 = arith.constant 0 : i32
    %c0_i32_1 = arith.constant 0 : i32
    return %c0_i32, %c0_i32_0 : i32, i32
  }
  func.func @transform_7(%arg0: i32) -> (i32, i32) {
    %c0_i32 = arith.constant 0 : i32
    %c0_i32_0 = arith.constant 0 : i32
    return %arg0, %c0_i32 : i32, i32
  }
}

</mosaic_0001>

<bundles_post_ra>
// kernel: tpu_custom_call.1
= control target key start
LH: loop header
LB: loop body
LE: loop exit
PB: predicated region body
PF: predicated region fallthrough
CT: control target
= control target key end

     0   :  { %s404_s0 = inlined_call_operand.hbm [shape: bf16[8,31], index: 0, kind: input, shape index: {}]   ;;  %s405_s1 = inlined_call_operand.hbm [shape: bf16[31,32], index: 1, kind: input, shape index: {}]   ;;  %s406_s2 = inlined_call_operand.vmem [shape: f32[1,32], index: 2, kind: input, shape index: {}]   ;;  %s407_s3 = inlined_call_operand.hbm [shape: bf16[32,64], index: 3, kind: input, shape index: {}]   ;;  %s408_s4 = inlined_call_operand.vmem [shape: f32[1,64], index: 4, kind: input, shape index: {}]   ;;  %s409_s5 = inlined_call_operand.vmem [shape: f32[1,64], index: 5, kind: input, shape index: {}]   ;;  %s410_s6 = inlined_call_operand.<no memory space> [shape: f32[1,1], index: 6, kind: input, shape index: {}]   ;;  %s411_s7 = inlined_call_operand.vmem [shape: f32[8,1], index: 7, kind: output, shape index: {}]  }
   0x1   :  { %v12_v0 = vstv %s410_s6 }
   0x2   :  { %13 = vst [vmem:[#allocation2] sm:$0x1] %v12_v0 }
   0x3   :  { %14 = vsyncpa [#allocation4], 0 }
   0x4   :  { %15 = vsyncpa [#allocation6], 0  ;;  %s31_s28 = sshll.u32 %s405_s1, 4  ;;  %s334_s29 = smov [#allocation5]   ;;  %s32_s28 = int_to_ptr.hbm [resolvable:$true] %s31_s28 }
   0x5   :  { %s33_s30 = sshll.u32 %s334_s29, 4  ;;  %s21_s10 = sshll.u32 %s404_s0, 4  ;;  %s34_s30 = int_to_ptr.vmem [resolvable:$true] %s33_s30  ;;  %s22_s10 = int_to_ptr.hbm [resolvable:$true] %s21_s10 }
   0x6   :  { %s335_s11 = smov 64   ;;  %s336_s12 = smov 4  }
   0x7   :  { %39 = dma.hbm_to_vmem [thread:$0]  %s32_s28, 256, %s34_s30, [#allocation6], %s335_s11, %s335_s11, %s336_s12  }
   0x8   :  { %s337_s6 = smov [#allocation3]   ;;  %s46_s16 = sshll.u32 %s407_s3, 4  ;;  %s47_s16 = int_to_ptr.hbm [resolvable:$true] %s46_s16 }
   0x9   :  { %s23_s13 = sshll.u32 %s337_s6, 4  ;;  %s338_s1 = smov [#allocation7]   ;;  %s24_s13 = int_to_ptr.vmem [resolvable:$true] %s23_s13 }
   0xa   :  { %26 = dma.hbm_to_vmem [thread:$0]  %s22_s10, 64, %s24_s13, [#allocation4]  }
   0xb   :  { %s48_s17 = sshll.u32 %s338_s1, 4  ;;  %s49_s17 = int_to_ptr.vmem [resolvable:$true] %s48_s17 }
   0xc   :  { %54 = dma.hbm_to_vmem [thread:$0]  %s47_s16, 256, %s49_s17, [#allocation6], %s335_s11, %s335_s11, %s336_s12  }
   0xd   :  { %330 = dma.done.wait [#allocation4], 64  }
   0xe   :  { %331 = vsyncadd [#allocation4], 4294967232 }
   0xf   :  { %332 = dma.done.wait [#allocation6], 512  }
  0x10   :  { %333 = vsyncadd [#allocation6], 4294966784  ;;  %vm98_vm0 = vcmask 1046528   ;;  %vm99_vm1 = vcmask 1047552   ;;  %v339_v1 = vmov 65535   ;;  %v237_v4 = vld [vmem:[#allocation5 + $0x8] sm:$0xff] }
  0x11   :  { %v100_v2 = vsel %vm98_vm0, 4294967295, %v339_v1  ;;  %v236_v6 = vld [vmem:[#allocation5] sm:$0xff]  ;;  %v74_v7 = vld [vmem:[#allocation3] sm:$0xf]  ;;  %vm94_vm2 = vcmask 252928   ;;  %v238_v9 = vld [vmem:[#allocation7] sm:$0xff] }
  0x12   :  { %v101_v3 = vsel %vm99_vm1, %v100_v2, 0  ;;  %v239_v8 = vld [vmem:[#allocation7 + $0x8] sm:$0xff]  ;;  %vm158_vm7 = vcmask 261120   ;;  %vm200_vm12 = vcmask 523264   ;;  %vm208_vm13 = vcmask 7168  }
  0x13   :  { %v103_v5 = vand.u32 %v237_v4, %v101_v3  ;;  %168 = vmatpush.bf16.msra.mxu1 %v239_v8  ;;  %v246_v10 = vld [vmem:[%s406_s2] ss:$0 sm:$0xff] }
  0x14   :  { %v247_v28 = vld [vmem:[%s408_s4] ss:$0 sm:$0xff] }
  0x15   :  { %111 = vmatpush.bf16.msra.mxu0 %v103_v5  ;;  %v248_v42 = vld [vmem:[%s409_s5] ss:$0 sm:$0xff] }
  0x16   :  { %v249_v48 = vld [vmem:[#allocation2] ss:$0 sm:$0xff] }
  0x17   :  { %169 = vmatpush.bf16.msra.mxu1 %v238_v9 }
  0x19   :  { %112 = vmatpush.bf16.msra.mxu0 %v236_v6 }
  0x1c   :  { %224 = vmatmul.msk.bf16.vlgmr.msra.gmra.mxu0 %vm94_vm2, %v74_v7 }
  0x99   :  { %v114_v11 = vpop.f32.mrf.mxu0 }
  0x9a   :  { %v115_v12 = vadd.f32 %v246_v10, %v114_v11 }
  0x9c   :  { %v225_v13 = vmul.f32 -1.442695, %v115_v12 }
  0x9e   :  { %250 = vpow2.f32 %v225_v13 }
  0xa1   :  { %v116_v14 = vpop.f32.mrf.mxu0 }
  0xa4   :  { %v251_v15 = vpop.eup %250 }
  0xa5   :  { %v121_v16 = vadd.f32 1.0, %v251_v15 }
  0xa7   :  { %252 = vrcp.f32 %v121_v16  ;;  %v133_v20 = vand.u32 2147483648, %v121_v16  ;;  %v131_v22 = vand.u32 2147483647, %v121_v16  ;;  %vm127_vm4 = vweird.f32 %v121_v16 }
  0xa9   :  { %v134_v24 = vor.u32 1.1754944e-38, %v133_v20  ;;  %vm132_vm6 = vcmp.eq.f32.partialorder %v131_v22, 8.507059e+37 }
  0xad   :  { %v253_v17 = vpop.eup %252 }
  0xae   :  { %v123_v18 = vmul.f32 %v253_v17, %v121_v16  ;;  %vm128_vm3 = vweird.f32 %v253_v17 }
  0xaf   :  { %vm129_vm5 = vmor %vm127_vm4, %vm128_vm3 }
  0xb0   :  { %v124_v19 = vsub.f32 1.0, %v123_v18 }
  0xb2   :  { %v125_v21 = vmul.f32 %v253_v17, %v124_v19 }
  0xb4   :  { %v126_v23 = vadd.f32 %v253_v17, %v125_v21 }
  0xb6   :  { %v130_v25 = vsel %vm129_vm5, %v253_v17, %v126_v23 }
  0xb7   :  { %v135_v26 = vsel %vm132_vm6, %v134_v24, %v130_v25 }
  0xb8   :  { %v137_v27 = vpack.c.bf16 %v135_v26, %v135_v26 }
  0xba   :  { %234 = vmatmul.msk.bf16.vlgmr.msra.gmra.mxu1 %vm158_vm7, %v137_v27 }
 0x137   :  { %v171_v29 = vpop.f32.mrf.mxu1 }
 0x138   :  { %v172_v30 = vadd.f32 %v247_v28, %v171_v29 }
 0x13a   :  { %v235_v31 = vmul.f32 -1.442695, %v172_v30 }
 0x13c   :  { %254 = vpow2.f32 %v235_v31 }
 0x13f   :  { %v173_v32 = vpop.f32.mrf.mxu1 }
 0x142   :  { %v255_v33 = vpop.eup %254 }
 0x143   :  { %v178_v34 = vadd.f32 1.0, %v255_v33 }
 0x145   :  { %256 = vrcp.f32 %v178_v34  ;;  %v190_v38 = vand.u32 2147483648, %v178_v34  ;;  %v188_v40 = vand.u32 2147483647, %v178_v34  ;;  %vm184_vm9 = vweird.f32 %v178_v34 }
 0x147   :  { %v191_v43 = vor.u32 1.1754944e-38, %v190_v38  ;;  %vm189_vm11 = vcmp.eq.f32.partialorder %v188_v40, 8.507059e+37 }
 0x14b   :  { %v257_v35 = vpop.eup %256 }
 0x14c   :  { %v180_v36 = vmul.f32 %v257_v35, %v178_v34  ;;  %vm185_vm8 = vweird.f32 %v257_v35 }
 0x14d   :  { %vm186_vm10 = vmor %vm184_vm9, %vm185_vm8 }
 0x14e   :  { %v181_v37 = vsub.f32 1.0, %v180_v36 }
 0x150   :  { %v182_v39 = vmul.f32 %v257_v35, %v181_v37 }
 0x152   :  { %v183_v41 = vadd.f32 %v257_v35, %v182_v39 }
 0x154   :  { %v187_v44 = vsel %vm186_vm10, %v257_v35, %v183_v41 }
 0x155   :  { %v192_v45 = vsel %vm189_vm11, %v191_v43, %v187_v44 }
 0x156   :  { %v199_v46 = vmul.f32 %v248_v42, %v192_v45 }
 0x158   :  { %v201_v47 = vsel %vm200_vm12, %v199_v46, 0.0 }
 0x159   :  { %202 = vadd.xlane.f32.xlu0 %v201_v47 }
 0x1cc   :  { %v203_v49 = vpop.xlane.xlu0 %202 }
 0x1cd   :  { %v207_v50 = vadd.f32 %v249_v48, %v203_v49 }
 0x1cf   :  { %209 = vst.msk [vmem:[%s411_s7] sm:$0xff] %vm208_vm13, %v207_v50 }
 0x1d0   :  { %214 = vsyncpa [#allocation4], 1 }
 0x1d1   :  { %215 = vsyncpa [#allocation6], 1 }

</bundles_post_ra>
